<compile_context>
chip_gen: v6e
topology: v6e:2x2x1
jax: 0.10.0
libtpu: 0.0.40
codegen_flags: <defaults>
</compile_context>

<pallas_src>
import functools
import math
import numpy as np
import jax
import jax.numpy as jnp
from jax import lax
from jax.experimental import pallas as pl
from jax.experimental.pallas import tpu as pltpu

# Matmul input dtype. f32 keeps the 1e-4 correctness tolerance in this test;
# set to jnp.bfloat16 on v6e/v7x production builds for MXU peak (accumulation
# stays f32 via preferred_element_type).
COMPUTE_DTYPE = jnp.float32


def _round_up(x, m):
    return (x + m - 1) // m * m


# ----------------------------- parameter setup (glue) ------------------------

def calculate_mask_index(kernel_length_now, largest_kernel_length):
    right = math.ceil((largest_kernel_length - 1) / 2) - math.ceil((kernel_length_now - 1) / 2)
    left = largest_kernel_length - kernel_length_now - right
    return left, left + kernel_length_now


def build_params(layer_parameter_list, key):
    """Deterministic synthetic version of creak_layer_mask (no checkpoint load)."""
    largest = layer_parameter_list[-1][-1]
    mask_list, w_list, b_list = [], [], []
    for (cin, cout, k) in layer_parameter_list:
        key, k1, k2 = jax.random.split(key, 3)
        bound = 1.0 / math.sqrt(cin * k)  # PyTorch Conv1d default init bound
        w = jax.random.uniform(k1, (cout, cin, k), jnp.float32, -bound, bound)
        b = jax.random.uniform(k2, (cout,), jnp.float32, -bound, bound)
        ind_l, ind_r = calculate_mask_index(k, largest)
        big_w = jnp.zeros((cout, cin, largest), jnp.float32).at[:, :, ind_l:ind_r].set(w)
        mask_np = np.ones((cout, cin, largest), np.float32)
        mask_np[:, :, :ind_l] = 0.0
        mask_np[:, :, ind_r:] = 0.0
        mask_list.append(jnp.asarray(mask_np))
        w_list.append(big_w)
        b_list.append(b)
    mask = jnp.concatenate(mask_list, axis=0)       # (C_out_total, C_in, K)
    init_w = jnp.concatenate(w_list, axis=0)        # (C_out_total, C_in, K)
    init_b = jnp.concatenate(b_list, axis=0)        # (C_out_total,)
    return mask, init_w, init_b


# ----------------------------- Pallas kernels --------------------------------

def conv_stats_kernel(p_ref, w_ref, b_ref, y_ref, stats_ref, *, mb, m_valid, compute_dtype):
    """Pass 1: one MXU matmul per tile (im2col conv) + bias, plus per-tile
    per-channel sum / sum-of-squares partials for BatchNorm.

    p_ref:     (Mb, KC_pad)     im2col patches tile
    w_ref:     (KC_pad, C_pad)  masked, reshaped, zero-padded weight (full)
    b_ref:     (1, C_pad)       bias
    y_ref:     (Mb, C_pad)      conv + bias output tile (f32)
    stats_ref: (1, 8, C_pad)    row 0 = sum, row 1 = sumsq over valid rows
    """
    y = jnp.dot(p_ref[...].astype(compute_dtype),
                w_ref[...].astype(compute_dtype),
                preferred_element_type=jnp.float32)
    y = y + b_ref[...]
    y_ref[...] = y

    cp = y.shape[-1]
    # Mask rows that are pure M-padding so they do not pollute the BN stats.
    row = pl.program_id(0) * mb + lax.broadcasted_iota(jnp.int32, (mb, cp), 0)
    yv = jnp.where(row < m_valid, y, 0.0)
    s = jnp.sum(yv, axis=0, keepdims=True)          # (1, C_pad)
    sq = jnp.sum(yv * yv, axis=0, keepdims=True)    # (1, C_pad)

    row8 = lax.broadcasted_iota(jnp.int32, (8, cp), 0)
    stats = jnp.where(row8 == 0, s, jnp.where(row8 == 1, sq, 0.0))
    stats_ref[...] = stats[None]


def bn_relu_kernel(y_ref, scale_ref, shift_ref, o_ref):
    """Pass 2: per-tile normalize + affine + ReLU (pure VPU epilogue)."""
    o_ref[...] = jnp.maximum(y_ref[...] * scale_ref[...] + shift_ref[...], 0.0
                             ).astype(o_ref.dtype)


# ----------------------------- wrapper ---------------------------------------

@jax.jit
def os_cnn_layer_forward(x, weight, mask, bias, gamma, beta):
    """x: (N, C_in, L) in PyTorch NCL layout. Returns (N, C_out, L)."""
    N, Cin, L = x.shape
    Cout, _, K = weight.shape
    eps = 1e-5

    pad_l, pad_r = (K - 1) // 2, K // 2
    M = N * L                       # flattened batch*length positions
    KC = K * Cin                    # im2col contraction size
    KCp = _round_up(KC, 128)        # lane/MXU-friendly contraction pad
    Cp = _round_up(Cout, 128)       # lane-dense output channels
    Mb = min(512, _round_up(M, 8))  # tile over M; small enough for v5e/v7x VMEM
    Mp = _round_up(M, Mb)
    G = Mp // Mb

    # --- glue (fused under jit): mask fold, im2col, lane padding -------------
    w2 = jnp.transpose(weight * mask, (2, 1, 0)).reshape(KC, Cout)   # (K*Cin, Cout), k-major
    w_pad = jnp.zeros((KCp, Cp), jnp.float32).at[:KC, :Cout].set(w2)
    b_pad = jnp.zeros((1, Cp), jnp.float32).at[0, :Cout].set(bias)

    xp = jnp.pad(x, ((0, 0), (0, 0), (pad_l, pad_r)))                # (N, Cin, L_pad)
    xp = jnp.transpose(xp, (0, 2, 1))                                # (N, L_pad, Cin)
    patches = jnp.stack([xp[:, k:k + L, :] for k in range(K)], axis=2)  # (N, L, K, Cin)
    patches = patches.reshape(M, KC)
    patches = jnp.zeros((Mp, KCp), jnp.float32).at[:M, :KC].set(patches)

    cparams = pltpu.CompilerParams(
        dimension_semantics=("parallel",),          # shards across TCs on v7x
        vmem_limit_bytes=32 * 1024 * 1024,          # safe on v5e/v6e/v7x
    )

    # --- pass 1: tiled conv (+bias) and per-tile BN partial stats ------------
    y, stats = pl.pallas_call(
        functools.partial(conv_stats_kernel, mb=Mb, m_valid=M,
                          compute_dtype=COMPUTE_DTYPE),
        grid=(G,),
        in_specs=[
            pl.BlockSpec((Mb, KCp), lambda i: (i, 0)),
            pl.BlockSpec((KCp, Cp), lambda i: (0, 0)),
            pl.BlockSpec((1, Cp), lambda i: (0, 0)),
        ],
        out_specs=(
            pl.BlockSpec((Mb, Cp), lambda i: (i, 0)),
            pl.BlockSpec((1, 8, Cp), lambda i: (i, 0, 0)),
        ),
        out_shape=(
            jax.ShapeDtypeStruct((Mp, Cp), jnp.float32),
            jax.ShapeDtypeStruct((G, 8, Cp), jnp.float32),
        ),
        compiler_params=cparams,
    )(patches, w_pad, b_pad)

    # --- tiny per-channel finalize (plain JAX; O(Cout) work) -----------------
    ssum = jnp.sum(stats[:, 0, :], axis=0)
    ssq = jnp.sum(stats[:, 1, :], axis=0)
    mean = ssum / M
    var = jnp.maximum(ssq / M - mean * mean, 0.0)   # biased batch variance
    inv = lax.rsqrt(var + eps)
    g_pad = jnp.zeros((Cp,), jnp.float32).at[:Cout].set(gamma)
    bt_pad = jnp.zeros((Cp,), jnp.float32).at[:Cout].set(beta)
    scale = (g_pad * inv).reshape(1, Cp)
    shift = (bt_pad - mean * g_pad * inv).reshape(1, Cp)
    # TODO(synk): BatchNorm running_mean/running_var buffer updates (training
    # side-effect state) are not modeled; only the forward output is produced.

    # --- pass 2: tiled normalize + affine + ReLU ------------------------------
    out_pad = pl.pallas_call(
        bn_relu_kernel,
        grid=(G,),
        in_specs=[
            pl.BlockSpec((Mb, Cp), lambda i: (i, 0)),
            pl.BlockSpec((1, Cp), lambda i: (0, 0)),
            pl.BlockSpec((1, Cp), lambda i: (0, 0)),
        ],
        out_specs=pl.BlockSpec((Mb, Cp), lambda i: (i, 0)),
        out_shape=jax.ShapeDtypeStruct((Mp, Cp), jnp.float32),
        compiler_params=cparams,
    )(y, scale, shift)

    out = out_pad[:M, :Cout].reshape(N, L, Cout)
    return jnp.transpose(out, (0, 2, 1))            # back to (N, C_out, L)


# ----------------------------- pure-JAX reference ----------------------------

def reference_forward(x, weight, mask, bias, gamma, beta):
    K = weight.shape[-1]
    w = weight * mask
    pad_l, pad_r = (K - 1) // 2, K // 2
    xp = jnp.pad(x, ((0, 0), (0, 0), (pad_l, pad_r)))
    y = lax.conv_general_dilated(xp, w, (1,), 'VALID',
                                 dimension_numbers=('NCH', 'OIH', 'NCH'))
    y = y + bias[None, :, None]
    mean = jnp.mean(y, axis=(0, 2), keepdims=True)
    var = jnp.mean((y - mean) ** 2, axis=(0, 2), keepdims=True)
    y = (y - mean) / jnp.sqrt(var + 1e-5)
    y = y * gamma[None, :, None] + beta[None, :, None]
    return jnp.maximum(y, 0.0)


# ----------------------------- main ------------------------------------------

if __name__ == "__main__":
    # layer_parameters like OS-CNN: list of (in_channels, out_channels, kernel_size)
    layer_parameters = [(4, 8, 3), (4, 8, 5), (4, 8, 7)]

    key = jax.random.PRNGKey(0)
    kp, kx = jax.random.split(key)

    mask, weight, bias = build_params(layer_parameters, kp)   # C_out_total = 24, K = 7
    Cout = weight.shape[0]
    gamma = jnp.ones((Cout,), jnp.float32)                     # BN default init
    beta = jnp.zeros((Cout,), jnp.float32)

    x = jax.random.normal(kx, (2, 4, 16), dtype=jnp.float32)   # (N, C_in, L)

    out = os_cnn_layer_forward(x, weight, mask, bias, gamma, beta)
    out = jax.block_until_ready(out)

    ref = reference_forward(x, weight, mask, bias, gamma, beta)
    assert out.shape == (2, Cout, 16)
    np.testing.assert_allclose(np.asarray(out), np.asarray(ref), rtol=1e-4, atol=1e-4)

    print("KERNEL_OK")
</pallas_src>

<mosaic_0001>
module attributes {stable_mosaic.version = 11 : i64} {
  func.func @bn_relu_kernel(%arg0: i32, %arg1: memref<32x128xf32, #tpu.memory_space<vmem>>, %arg2: memref<1x128xf32, #tpu.memory_space<vmem>>, %arg3: memref<1x128xf32, #tpu.memory_space<vmem>>, %arg4: memref<32x128xf32, #tpu.memory_space<vmem>>) attributes {dimension_semantics = [#tpu.dimension_semantics<parallel>], iteration_bounds = array<i64: 1>, scalar_prefetch = 0 : i64, scratch_operands = 0 : i64, tpu.core_type = #tpu.core_type<tc>, window_params = [{transform_indices = @transform_0, window_bounds = array<i64: 32, 128>}, {pipeline_mode = #tpu.pipeline_mode<synchronous>, transform_indices = @transform_1, window_bounds = array<i64: 1, 128>}, {pipeline_mode = #tpu.pipeline_mode<synchronous>, transform_indices = @transform_2, window_bounds = array<i64: 1, 128>}, {transform_indices = @transform_3, window_bounds = array<i64: 32, 128>}]} {
    %c0 = arith.constant 0 : index
    %c0_0 = arith.constant 0 : index
    %0 = vector.load %arg1[%c0, %c0_0] : memref<32x128xf32, #tpu.memory_space<vmem>>, vector<32x128xf32>
    %c0_1 = arith.constant 0 : index
    %c0_2 = arith.constant 0 : index
    %1 = vector.load %arg2[%c0_1, %c0_2] : memref<1x128xf32, #tpu.memory_space<vmem>>, vector<1x128xf32>
    %2 = vector.broadcast %1 : vector<1x128xf32> to vector<32x128xf32>
    %3 = arith.mulf %0, %2 : vector<32x128xf32>
    %c0_3 = arith.constant 0 : index
    %c0_4 = arith.constant 0 : index
    %4 = vector.load %arg3[%c0_3, %c0_4] : memref<1x128xf32, #tpu.memory_space<vmem>>, vector<1x128xf32>
    %5 = vector.broadcast %4 : vector<1x128xf32> to vector<32x128xf32>
    %6 = arith.addf %3, %5 : vector<32x128xf32>
    %cst = arith.constant 0.000000e+00 : f32
    %7 = vector.broadcast %cst : f32 to vector<32x128xf32>
    %8 = arith.maximumf %6, %7 : vector<32x128xf32>
    %c0_5 = arith.constant 0 : index
    %c0_6 = arith.constant 0 : index
    %9 = vector.load %arg4[%c0_5, %c0_6] : memref<32x128xf32, #tpu.memory_space<vmem>>, vector<32x128xf32>
    tpu.vector_store %arg4[%c0_5, %c0_6], %8 {strides = array<i32>} : memref<32x128xf32, #tpu.memory_space<vmem>>, vector<32x128xf32>,
    return
  }
  func.func @transform_0(%arg0: i32) -> (i32, i32) {
    %c0_i32 = arith.constant 0 : i32
    %c0_i32_0 = arith.constant 0 : i32
    return %arg0, %c0_i32 : i32, i32
  }
  func.func @transform_1(%arg0: i32) -> (i32, i32) {
    %c0_i32 = arith.constant 0 : i32
    %c0_i32_0 = arith.constant 0 : i32
    %c0_i32_1 = arith.constant 0 : i32
    return %c0_i32, %c0_i32_0 : i32, i32
  }
  func.func @transform_2(%arg0: i32) -> (i32, i32) {
    %c0_i32 = arith.constant 0 : i32
    %c0_i32_0 = arith.constant 0 : i32
    %c0_i32_1 = arith.constant 0 : i32
    return %c0_i32, %c0_i32_0 : i32, i32
  }
  func.func @transform_3(%arg0: i32) -> (i32, i32) {
    %c0_i32 = arith.constant 0 : i32
    %c0_i32_0 = arith.constant 0 : i32
    return %arg0, %c0_i32 : i32, i32
  }
}

module attributes {stable_mosaic.version = 11 : i64} {
  func.func @conv_stats_kernel(%arg0: i32, %arg1: memref<32x128xf32, #tpu.memory_space<vmem>>, %arg2: memref<128x128xf32, #tpu.memory_space<vmem>>, %arg3: memref<1x128xf32, #tpu.memory_space<vmem>>, %arg4: memref<32x128xf32, #tpu.memory_space<vmem>>, %arg5: memref<1x8x128xf32, #tpu.memory_space<vmem>>) attributes {dimension_semantics = [#tpu.dimension_semantics<parallel>], iteration_bounds = array<i64: 1>, scalar_prefetch = 0 : i64, scratch_operands = 0 : i64, tpu.core_type = #tpu.core_type<tc>, window_params = [{transform_indices = @transform_0, window_bounds = array<i64: 32, 128>}, {pipeline_mode = #tpu.pipeline_mode<synchronous>, transform_indices = @transform_1, window_bounds = array<i64: 128, 128>}, {pipeline_mode = #tpu.pipeline_mode<synchronous>, transform_indices = @transform_2, window_bounds = array<i64: 1, 128>}, {transform_indices = @transform_3, window_bounds = array<i64: 32, 128>}, {transform_indices = @transform_4, window_bounds = array<i64: 1, 8, 128>}]} {
    %c0 = arith.constant 0 : index
    %c0_0 = arith.constant 0 : index
    %0 = vector.load %arg1[%c0, %c0_0] : memref<32x128xf32, #tpu.memory_space<vmem>>, vector<32x128xf32>
    %c0_1 = arith.constant 0 : index
    %c0_2 = arith.constant 0 : index
    %1 = vector.load %arg2[%c0_1, %c0_2] : memref<128x128xf32, #tpu.memory_space<vmem>>, vector<128x128xf32>
    %cst = arith.constant dense<0.000000e+00> : vector<32x128xf32>
    %2 = tpu.matmul %0, %1, %cst {dimension_numbers = #tpu.dot_dimension_numbers<[1], [0], [0], [1], [0, 0, 1, 1], [], []>} : vector<32x128xf32>, vector<128x128xf32>, vector<32x128xf32> -> vector<32x128xf32>
    %c0_3 = arith.constant 0 : index
    %c0_4 = arith.constant 0 : index
    %3 = vector.load %arg3[%c0_3, %c0_4] : memref<1x128xf32, #tpu.memory_space<vmem>>, vector<1x128xf32>
    %4 = vector.broadcast %3 : vector<1x128xf32> to vector<32x128xf32>
    %5 = arith.addf %2, %4 : vector<32x128xf32>
    %c0_5 = arith.constant 0 : index
    %c0_6 = arith.constant 0 : index
    %6 = vector.load %arg4[%c0_5, %c0_6] : memref<32x128xf32, #tpu.memory_space<vmem>>, vector<32x128xf32>
    tpu.vector_store %arg4[%c0_5, %c0_6], %5 {strides = array<i32>} : memref<32x128xf32, #tpu.memory_space<vmem>>, vector<32x128xf32>,
    %c32_i32 = arith.constant 32 : i32
    %7 = arith.muli %arg0, %c32_i32 : i32
    %8 = tpu.iota {dimensions = array<i32: 0>} : vector<32x128xi32>
    %9 = vector.broadcast %7 : i32 to vector<32x128xi32>
    %10 = arith.addi %9, %8 : vector<32x128xi32>
    %c32_i32_7 = arith.constant 32 : i32
    %11 = vector.broadcast %c32_i32_7 : i32 to vector<32x128xi32>
    %12 = arith.cmpi slt, %10, %11 : vector<32x128xi32>
    %cst_8 = arith.constant 0.000000e+00 : f32
    %13 = vector.broadcast %cst_8 : f32 to vector<32x128xf32>
    %14 = arith.select %12, %5, %13 : vector<32x128xi1>, vector<32x128xf32>
    %cst_9 = arith.constant dense<0.000000e+00> : vector<128xf32>
    %15 = vector.multi_reduction <add>, %14, %cst_9 [0] : vector<32x128xf32> to vector<128xf32>
    %16 = vector.shape_cast %15 : vector<128xf32> to vector<1x128xf32>
    %17 = arith.mulf %14, %14 : vector<32x128xf32>
    %cst_10 = arith.constant dense<0.000000e+00> : vector<128xf32>
    %18 = vector.multi_reduction <add>, %17, %cst_10 [0] : vector<32x128xf32> to vector<128xf32>
    %19 = vector.shape_cast %18 : vector<128xf32> to vector<1x128xf32>
    %20 = tpu.iota {dimensions = array<i32: 0>} : vector<8x128xi32>
    %c0_i32 = arith.constant 0 : i32
    %21 = vector.broadcast %c0_i32 : i32 to vector<8x128xi32>
    %22 = arith.cmpi eq, %20, %21 : vector<8x128xi32>
    %c1_i32 = arith.constant 1 : i32
    %23 = vector.broadcast %c1_i32 : i32 to vector<8x128xi32>
    %24 = arith.cmpi eq, %20, %23 : vector<8x128xi32>
    %cst_11 = arith.constant 0.000000e+00 : f32
    %25 = vector.shape_cast %19 : vector<1x128xf32> to vector<1x128xf32>
    %26 = vector.broadcast %25 : vector<1x128xf32> to vector<8x128xf32>
    %27 = vector.broadcast %cst_11 : f32 to vector<8x128xf32>
    %28 = arith.select %24, %26, %27 : vector<8x128xi1>, vector<8x128xf32>
    %29 = vector.shape_cast %16 : vector<1x128xf32> to vector<1x128xf32>
    %30 = vector.broadcast %29 : vector<1x128xf32> to vector<8x128xf32>
    %31 = arith.select %22, %30, %28 : vector<8x128xi1>, vector<8x128xf32>
    %32 = vector.shape_cast %31 : vector<8x128xf32> to vector<1x8x128xf32>
    %c0_12 = arith.constant 0 : index
    %c0_13 = arith.constant 0 : index
    %c0_14 = arith.constant 0 : index
    %33 = vector.load %arg5[%c0_12, %c0_13, %c0_14] : memref<1x8x128xf32, #tpu.memory_space<vmem>>, vector<1x8x128xf32>
    tpu.vector_store %arg5[%c0_12, %c0_13, %c0_14], %32 {strides = array<i32>} : memref<1x8x128xf32, #tpu.memory_space<vmem>>, vector<1x8x128xf32>,
    return
  }
  func.func @transform_0(%arg0: i32) -> (i32, i32) {
    %c0_i32 = arith.constant 0 : i32
    %c0_i32_0 = arith.constant 0 : i32
    return %arg0, %c0_i32 : i32, i32
  }
  func.func @transform_1(%arg0: i32) -> (i32, i32) {
    %c0_i32 = arith.constant 0 : i32
    %c0_i32_0 = arith.constant 0 : i32
    %c0_i32_1 = arith.constant 0 : i32
    return %c0_i32, %c0_i32_0 : i32, i32
  }
  func.func @transform_2(%arg0: i32) -> (i32, i32) {
    %c0_i32 = arith.constant 0 : i32
    %c0_i32_0 = arith.constant 0 : i32
    %c0_i32_1 = arith.constant 0 : i32
    return %c0_i32, %c0_i32_0 : i32, i32
  }
  func.func @transform_3(%arg0: i32) -> (i32, i32) {
    %c0_i32 = arith.constant 0 : i32
    %c0_i32_0 = arith.constant 0 : i32
    return %arg0, %c0_i32 : i32, i32
  }
  func.func @transform_4(%arg0: i32) -> (i32, i32, i32) {
    %c0_i32 = arith.constant 0 : i32
    %c0_i32_0 = arith.constant 0 : i32
    %c0_i32_1 = arith.constant 0 : i32
    return %arg0, %c0_i32, %c0_i32_0 : i32, i32, i32
  }
}

</mosaic_0001>

<bundles_post_ra>
// kernel: os_cnn_layer_forward.3
= control target key start
LH: loop header
LB: loop body
LE: loop exit
PB: predicated region body
PF: predicated region fallthrough
CT: control target
= control target key end

     0   :  { %s136_s0 = inlined_call_operand.vmem [shape: f32[32,128], index: 0, kind: input, shape index: {}]   ;;  %s137_s1 = inlined_call_operand.vmem [shape: f32[1,128], index: 1, kind: input, shape index: {}]   ;;  %s138_s2 = inlined_call_operand.vmem [shape: f32[1,128], index: 2, kind: input, shape index: {}]   ;;  %s139_s3 = inlined_call_operand.hbm [shape: f32[32,128], index: 3, kind: output, shape index: {}]  }
   0x1   :  { %v15_v0 = vld [vmem:[%s136_s0] sm:$0xff]  ;;  %v16_v4 = vld [vmem:[%s136_s0 + $0x8] sm:$0xff]  ;;  %v17_v5 = vld [vmem:[%s136_s0 + $0x10] sm:$0xff] }
   0x2   :  { %v65_v1 = vld [vmem:[%s137_s1] ss:$0 sm:$0xff]  ;;  %v18_v6 = vld [vmem:[%s136_s0 + $0x18] sm:$0xff] }
   0x3   :  { %v66_v2 = vld [vmem:[%s138_s2] ss:$0 sm:$0xff]  ;;  %v26_v3 = vmul.f32 %v65_v1, %v15_v0  ;;  %v27_v7 = vmul.f32 %v65_v1, %v16_v4  ;;  %v28_v8 = vmul.f32 %v65_v1, %v17_v5  ;;  %v29_v9 = vmul.f32 %v65_v1, %v18_v6 }
   0x4   :  { %8 = vsyncpa [#allocation3], 0  ;;  %s92_s1 = smov [#allocation2]  }
   0x5   :  { %v37_v10 = vadd.f32 %v66_v2, %v26_v3  ;;  %s54_s2 = sshll.u32 %s92_s1, 4  ;;  %v38_v11 = vadd.f32 %v66_v2, %v27_v7  ;;  %v39_v12 = vadd.f32 %v66_v2, %v28_v8  ;;  %v40_v13 = vadd.f32 %v66_v2, %v29_v9  ;;  %s55_s2 = int_to_ptr.vmem [resolvable:$true] %s54_s2 }
   0x6   :  { %s70_s0 = scalar_lea.vmem %s55_s2, 512  ;;  %p75_p1 = scmp.lt.s32.totalorder %s55_s2, %s55_s2 }
   0x7   :  { %v41_v14 = vmax.f32 %v37_v10, 0.0  ;;  %v42_v15 = vmax.f32 %v38_v11, 0.0  ;;  %v43_v16 = vmax.f32 %v39_v12, 0.0  ;;  %v44_v17 = vmax.f32 %v40_v13, 0.0  ;;  %p71_p0 = scmp.ne.s32.totalorder %s55_s2, %s70_s0  ;;  %p76_p2 = scmp.lt.s32.totalorder %s70_s0, %s70_s0 }
   0x9   :  { %45 = vst [vmem:[#allocation2] sm:$0xff] %v41_v14  ;;  %46 = vst [vmem:[#allocation2 + $0x8] sm:$0xff] %v42_v15  ;;  %p77_p3 = por %p76_p2, %p75_p1 }
   0xa   :  { %47 = vst [vmem:[#allocation2 + $0x10] sm:$0xff] %v43_v16  ;;  %48 = vst [vmem:[#allocation2 + $0x18] sm:$0xff] %v44_v17 }
   0xb   :  { %p78_p4 = pnand %p77_p3, %p71_p0 }
   0xd   :  { %81 = shalt.err (!%p78_p4)
}
   0xe   :  { %s93_s24 = smov 128   ;;  %s94_s25 = smov 8  }
   0xf   :  { %60 = dma.vmem_to_hbm [thread:$0]  %s55_s2, 512, %s139_s3, [#allocation3], %s93_s24, %s93_s24, %s94_s25  }
  0x10   :  { %90 = dma.done.wait [#allocation3], 512  }
  0x11   :  { %91 = vsyncadd [#allocation3], 4294966784 }
  0x12   :  { %64 = vsyncpa [#allocation3], 1 }

// kernel: os_cnn_layer_forward.2
= control target key start
LH: loop header
LB: loop body
LE: loop exit
PB: predicated region body
PF: predicated region fallthrough
CT: control target
= control target key end

     0   :  { %v133_v42 = vlaneseq  ;;  %s380_s1 = inlined_call_operand.vmem [shape: f32[128,128], index: 1, kind: input, shape index: {}]   ;;  %s381_s0 = inlined_call_operand.vmem [shape: f32[32,128], index: 0, kind: input, shape index: {}]   ;;  %s382_s2 = inlined_call_operand.vmem [shape: f32[1,128], index: 2, kind: input, shape index: {}]   ;;  %s383_s3 = inlined_call_operand.vmem [shape: f32[32,128], index: 3, kind: output, shape index: {0}]   ;;  %s384_s4 = inlined_call_operand.vmem [shape: f32[1,8,128], index: 4, kind: output, shape index: {1}]  }
   0x1   :  { %v35_v0 = vld [vmem:[%s380_s1 + $0x78] sm:$0xff]  ;;  %v34_v1 = vld [vmem:[%s380_s1 + $0x70] sm:$0xff]  ;;  %v33_v2 = vld [vmem:[%s380_s1 + $0x68] sm:$0xff] }
   0x2   :  { %207 = vmatprep.subr.mxu0 %v35_v0  ;;  %245 = vmatprep.subr.mxu1 %v35_v0  ;;  %v32_v3 = vld [vmem:[%s380_s1 + $0x60] sm:$0xff]  ;;  %v31_v4 = vld [vmem:[%s380_s1 + $0x58] sm:$0xff]  ;;  %v30_v5 = vld [vmem:[%s380_s1 + $0x50] sm:$0xff]  ;;  %v134_v47 = vshrl.u32 %v133_v42, 7 }
   0x3   :  { %208 = vmatpush3.msra.mxu0 %v35_v0  ;;  %261 = vmatpush3.msra.mxu1 %v35_v0  ;;  %v29_v6 = vld [vmem:[%s380_s1 + $0x48] sm:$0xff]  ;;  %v28_v7 = vld [vmem:[%s380_s1 + $0x40] sm:$0xff]  ;;  %v27_v8 = vld [vmem:[%s380_s1 + $0x38] sm:$0xff] }
   0x4   :  { %209 = vmatprep.subr.mxu0 %v34_v1  ;;  %246 = vmatprep.subr.mxu1 %v34_v1  ;;  %v26_v9 = vld [vmem:[%s380_s1 + $0x30] sm:$0xff]  ;;  %v25_v10 = vld [vmem:[%s380_s1 + $0x28] sm:$0xff]  ;;  %v24_v11 = vld [vmem:[%s380_s1 + $0x20] sm:$0xff]  ;;  %vm174_vm0 = vcmp.eq.s32.totalorder %v134_v47, 1  ;;  %vm173_vm1 = vcmp.eq.s32.totalorder %v134_v47, 0 }
   0x5   :  { %210 = vmatpush3.msra.mxu0 %v34_v1  ;;  %262 = vmatpush3.msra.mxu1 %v34_v1  ;;  %v23_v12 = vld [vmem:[%s380_s1 + $0x18] sm:$0xff]  ;;  %v22_v13 = vld [vmem:[%s380_s1 + $0x10] sm:$0xff]  ;;  %v21_v14 = vld [vmem:[%s380_s1 + $0x8] sm:$0xff] }
   0x6   :  { %211 = vmatprep.subr.mxu0 %v33_v2  ;;  %247 = vmatprep.subr.mxu1 %v33_v2  ;;  %v20_v15 = vld [vmem:[%s380_s1] sm:$0xff]  ;;  %v18_v17 = vld [vmem:[%s381_s0 + $0x10] sm:$0xff]  ;;  %v17_v18 = vld [vmem:[%s381_s0 + $0x8] sm:$0xff] }
   0x7   :  { %212 = vmatpush3.msra.mxu0 %v33_v2  ;;  %263 = vmatpush3.msra.mxu1 %v33_v2  ;;  %v16_v16 = vld [vmem:[%s381_s0] sm:$0xff]  ;;  %v19_v19 = vld [vmem:[%s381_s0 + $0x18] sm:$0xff] }
   0x8   :  { %213 = vmatprep.subr.mxu0 %v32_v3  ;;  %248 = vmatprep.subr.mxu1 %v32_v3  ;;  %v186_v20 = vld [vmem:[%s382_s2] ss:$0 sm:$0xff] }
   0x9   :  { %214 = vmatpush3.msra.mxu0 %v32_v3  ;;  %264 = vmatpush3.msra.mxu1 %v32_v3 }
   0xa   :  { %215 = vmatprep.subr.mxu0 %v31_v4  ;;  %249 = vmatprep.subr.mxu1 %v31_v4 }
   0xb   :  { %216 = vmatpush3.msra.mxu0 %v31_v4  ;;  %265 = vmatpush3.msra.mxu1 %v31_v4 }
   0xc   :  { %217 = vmatprep.subr.mxu0 %v30_v5  ;;  %250 = vmatprep.subr.mxu1 %v30_v5 }
   0xd   :  { %218 = vmatpush3.msra.mxu0 %v30_v5  ;;  %266 = vmatpush3.msra.mxu1 %v30_v5 }
   0xe   :  { %219 = vmatprep.subr.mxu0 %v29_v6  ;;  %251 = vmatprep.subr.mxu1 %v29_v6 }
   0xf   :  { %220 = vmatpush3.msra.mxu0 %v29_v6  ;;  %267 = vmatpush3.msra.mxu1 %v29_v6 }
  0x10   :  { %221 = vmatprep.subr.mxu0 %v28_v7  ;;  %252 = vmatprep.subr.mxu1 %v28_v7 }
  0x11   :  { %222 = vmatpush3.msra.mxu0 %v28_v7  ;;  %268 = vmatpush3.msra.mxu1 %v28_v7 }
  0x12   :  { %223 = vmatprep.subr.mxu0 %v27_v8  ;;  %253 = vmatprep.subr.mxu1 %v27_v8 }
  0x13   :  { %224 = vmatpush3.msra.mxu0 %v27_v8  ;;  %269 = vmatpush3.msra.mxu1 %v27_v8 }
  0x14   :  { %225 = vmatprep.subr.mxu0 %v26_v9  ;;  %254 = vmatprep.subr.mxu1 %v26_v9 }
  0x15   :  { %226 = vmatpush3.msra.mxu0 %v26_v9  ;;  %270 = vmatpush3.msra.mxu1 %v26_v9 }
  0x16   :  { %227 = vmatprep.subr.mxu0 %v25_v10  ;;  %255 = vmatprep.subr.mxu1 %v25_v10 }
  0x17   :  { %228 = vmatpush3.msra.mxu0 %v25_v10  ;;  %271 = vmatpush3.msra.mxu1 %v25_v10 }
  0x18   :  { %229 = vmatprep.subr.mxu0 %v24_v11  ;;  %256 = vmatprep.subr.mxu1 %v24_v11 }
  0x19   :  { %230 = vmatpush3.msra.mxu0 %v24_v11  ;;  %272 = vmatpush3.msra.mxu1 %v24_v11 }
  0x1a   :  { %231 = vmatprep.subr.mxu0 %v23_v12  ;;  %257 = vmatprep.subr.mxu1 %v23_v12 }
  0x1b   :  { %232 = vmatpush3.msra.mxu0 %v23_v12  ;;  %273 = vmatpush3.msra.mxu1 %v23_v12 }
  0x1c   :  { %233 = vmatprep.subr.mxu0 %v22_v13  ;;  %258 = vmatprep.subr.mxu1 %v22_v13 }
  0x1d   :  { %234 = vmatpush3.msra.mxu0 %v22_v13  ;;  %274 = vmatpush3.msra.mxu1 %v22_v13 }
  0x1e   :  { %235 = vmatprep.subr.mxu0 %v21_v14  ;;  %259 = vmatprep.subr.mxu1 %v21_v14 }
  0x1f   :  { %236 = vmatpush3.msra.mxu0 %v21_v14  ;;  %275 = vmatpush3.msra.mxu1 %v21_v14 }
  0x20   :  { %237 = vmatprep.subr.mxu0 %v20_v15  ;;  %260 = vmatprep.subr.mxu1 %v20_v15 }
  0x21   :  { %238 = vmatpush3.msra.mxu0 %v20_v15  ;;  %276 = vmatpush3.msra.mxu1 %v20_v15 }
  0x22   :  { %239 = vmatprep.mubr.f32.mxu0 %v16_v16  ;;  %242 = vmatprep.mubr.f32.mxu1 %v18_v17 }
  0x23   :  { %240 = vmatmul.mubr.f32.vlgmr.msra.gmra.mxu0 %v17_v18  ;;  %243 = vmatmul.mubr.f32.vlgmr.msra.gmra.mxu1 %v19_v19 }
  0xe3   :  { %v241_v21 = vpop.f32.mrf.mxu0  ;;  %v244_v22 = vpop.f32.mrf.mxu1 }
  0xe4   :  { %v115_v23 = vadd.f32 %v241_v21, %v186_v20  ;;  %v125_v24 = vadd.f32 %v244_v22, %v186_v20 }
  0xe5   :  { %v109_v25 = vpop.f32.mrf.mxu0  ;;  %v119_v26 = vpop.f32.mrf.mxu1 }
  0xe6   :  { %129 = vst [vmem:[%s383_s3 + $0x8] sm:$0xff] %v115_v23  ;;  %131 = vst [vmem:[%s383_s3 + $0x18] sm:$0xff] %v125_v24  ;;  %v110_v27 = vadd.f32 %v186_v20, %v109_v25  ;;  %v120_v28 = vadd.f32 %v186_v20, %v119_v26  ;;  %v161_v29 = vmul.f32 %v115_v23, %v115_v23 }
  0xe7   :  { %v163_v35 = vmul.f32 %v125_v24, %v125_v24 }
  0xe8   :  { %128 = vst [vmem:[%s383_s3] sm:$0xff] %v110_v27  ;;  %v151_v30 = vadd.f32 %v115_v23, %v110_v27  ;;  %v160_v31 = vmul.f32 %v110_v27, %v110_v27  ;;  %130 = vst [vmem:[%s383_s3 + $0x10] sm:$0xff] %v120_v28  ;;  %v162_v34 = vmul.f32 %v120_v28, %v120_v28 }
  0xea   :  { %v164_v32 = vadd.f32 %v161_v29, %v160_v31  ;;  %v152_v33 = vadd.f32 %v151_v30, %v120_v28 }
  0xec   :  { %v153_v36 = vadd.f32 %v152_v33, %v125_v24  ;;  %v165_v37 = vadd.f32 %v164_v32, %v162_v34 }
  0xee   :  { %v154_v38 = vrot.slane %v153_v36, 4  ;;  %v166_v39 = vadd.f32 %v165_v37, %v163_v35 }
  0xf0   :  { %v155_v40 = vadd.f32 %v154_v38, %v153_v36  ;;  %v167_v41 = vrot.slane %v166_v39, 4 }
  0xf2   :  { %v156_v43 = vrot.slane %v155_v40, 2  ;;  %v168_v44 = vadd.f32 %v167_v41, %v166_v39 }
  0xf4   :  { %v157_v45 = vadd.f32 %v156_v43, %v155_v40  ;;  %v169_v46 = vrot.slane %v168_v44, 2 }
  0xf6   :  { %v170_v48 = vadd.f32 %v169_v46, %v168_v44  ;;  %v158_v49 = vrot.slane %v157_v45, 1 }
  0xf8   :  { %v171_v50 = vrot.slane %v170_v48, 1  ;;  %v159_v52 = vadd.f32 %v158_v49, %v157_v45 }
  0xfa   :  { %v172_v51 = vadd.f32 %v171_v50, %v170_v48 }
  0xfc   :  { %v175_v53 = vsel %vm174_vm0, %v172_v51, 0.0 }
  0xfd   :  { %v176_v54 = vsel %vm173_vm1, %v159_v52, %v175_v53 }
  0xfe   :  { %177 = vst [vmem:[%s384_s4] sm:$0xff] %v176_v54 }

</bundles_post_ra>
